<compile_context>
chip_gen: v5e
topology: v5e:2x2
jax: 0.10.0
libtpu: 0.0.40
codegen_flags: <defaults>
</compile_context>

<pallas_src>
import functools

import jax
import jax.numpy as jnp
from jax import lax
from jax.experimental import pallas as pl
from jax.experimental.pallas import tpu as pltpu


def _round_up(v, m):
    return ((v + m - 1) // m) * m


def _aggregate_kernel(x_ref, bcol_ref, brow_ref, w1_ref, b1_ref, w2_ref, b2_ref,
                      out_ref, m_ref, l_ref, acc_ref):
    tile_n = x_ref.shape[0]
    g_pad = out_ref.shape[0]
    neg_big = jnp.float32(-1e30)

    i = pl.program_id(0)

    @pl.when(i == 0)
    def _init():
        m_ref[...] = jnp.full_like(m_ref, neg_big)
        l_ref[...] = jnp.zeros_like(l_ref)
        acc_ref[...] = jnp.zeros_like(acc_ref)

    x = x_ref[...]                       # [tile_n, F_pad] f32
    bcol = bcol_ref[...]                 # [tile_n, 1] int32 (graph id per node)
    brow = brow_ref[...]                 # [1, tile_n] int32

    # ---- gate MLP: Linear(F,F) -> ReLU -> Linear(F,1) ----------------------
    h = jnp.dot(x, w1_ref[...], preferred_element_type=jnp.float32) + b1_ref[...]
    h = jnp.maximum(h, 0.0)
    # second linear as VPU multiply + lane reduce (w2 passed as a [1, F_pad] row)
    gate = jnp.sum(h * w2_ref[...], axis=1, keepdims=True) + b2_ref[0, 0]   # [tile_n, 1]

    # padded rows carry sentinel id == g_pad -> mask their gate so exp() -> 0
    valid = bcol < g_pad
    gate = jnp.where(valid, gate, neg_big)

    # ---- node-major membership (nodes on sublanes, graphs on lanes) --------
    lane_gid = lax.broadcasted_iota(jnp.int32, (tile_n, g_pad), 1)
    member = lane_gid == bcol            # [tile_n, g_pad] bool, one True per valid row

    # ---- online per-graph max ----------------------------------------------
    masked = jnp.where(member, gate, neg_big)                # [tile_n, g_pad]
    tile_max = jnp.max(masked, axis=0, keepdims=True)        # [1, g_pad]
    m_old = m_ref[...]
    m_new = jnp.maximum(m_old, tile_max)
    alpha = jnp.exp(m_old - m_new)                           # [1, g_pad]

    # per-node shift m_new[batch[i]] via the one-hot (exactly one member/row)
    node_max = jnp.sum(jnp.where(member, m_new, 0.0), axis=1, keepdims=True)  # [tile_n,1]
    p = jnp.exp(gate - node_max)                             # [tile_n, 1]

    tile_sum = jnp.sum(jnp.where(member, p, 0.0), axis=0, keepdims=True)      # [1, g_pad]
    l_ref[...] = alpha * l_ref[...] + tile_sum
    m_ref[...] = m_new

    # ---- scatter-add in graph-major (transposed) layout: plain MXU matmul ---
    sub_gid = lax.broadcasted_iota(jnp.int32, (g_pad, tile_n), 0)
    onehot_t = (sub_gid == brow).astype(jnp.float32)         # [g_pad, tile_n]
    contrib = jnp.dot(onehot_t, p * x, preferred_element_type=jnp.float32)    # [g_pad, F_pad]

    # row -> column for alpha via a diag select (avoids an in-kernel transpose)
    r_ix = lax.broadcasted_iota(jnp.int32, (g_pad, g_pad), 0)
    c_ix = lax.broadcasted_iota(jnp.int32, (g_pad, g_pad), 1)
    diag = r_ix == c_ix
    alpha_col = jnp.sum(jnp.where(diag, alpha, 0.0), axis=1, keepdims=True)   # [g_pad, 1]

    acc_ref[...] = alpha_col * acc_ref[...] + contrib

    @pl.when(i == pl.num_programs(0) - 1)
    def _finalize():
        inv_row = pl.reciprocal(l_ref[...] + jnp.float32(1e-16))              # [1, g_pad]
        inv_col = jnp.sum(jnp.where(diag, inv_row, 0.0), axis=1, keepdims=True)
        out_ref[...] = acc_ref[...] * inv_col


@functools.partial(jax.jit, static_argnames=("num_graphs", "tile_n"))
def basic_block_to_graph_aggregate(x, batch, num_graphs, w1, b1, w2, b2, *, tile_n=512):
    """x: [N, F] f32, batch: [N] int32 graph ids in [0, num_graphs). Returns [num_graphs, F]."""
    N, F = x.shape
    G = int(num_graphs)

    F_pad = _round_up(F, 128)
    G_pad = _round_up(max(G, 1), 8)
    tile_n = max(128, (min(tile_n, _round_up(N, 128)) // 128) * 128)
    N_pad = _round_up(N, tile_n)
    n_tiles = N_pad // tile_n

    # zero-pad features; padded rows get sentinel graph id == G_pad (matches nothing)
    xp = jnp.zeros((N_pad, F_pad), jnp.float32).at[:N, :F].set(x.astype(jnp.float32))
    bids = jnp.full((N_pad,), G_pad, dtype=jnp.int32).at[:N].set(batch.astype(jnp.int32))
    bcol = bids.reshape(N_pad, 1)
    brow = bids.reshape(1, N_pad)

    w1p = jnp.zeros((F_pad, F_pad), jnp.float32).at[:F, :F].set(w1.astype(jnp.float32))
    b1p = jnp.zeros((1, F_pad), jnp.float32).at[:, :F].set(
        jnp.asarray(b1, jnp.float32).reshape(1, F))
    w2row = jnp.zeros((1, F_pad), jnp.float32).at[:, :F].set(
        jnp.asarray(w2, jnp.float32).reshape(1, F))
    b2a = jnp.asarray(b2, jnp.float32).reshape(1, 1)

    grid_spec = pltpu.PrefetchScalarGridSpec(
        num_scalar_prefetch=0,
        grid=(n_tiles,),
        in_specs=[
            pl.BlockSpec((tile_n, F_pad), lambda i: (i, 0)),   # x tile
            pl.BlockSpec((tile_n, 1), lambda i: (i, 0)),       # batch ids (column)
            pl.BlockSpec((1, tile_n), lambda i: (0, i)),       # batch ids (row)
            pl.BlockSpec((F_pad, F_pad), lambda i: (0, 0)),    # W1 (resident)
            pl.BlockSpec((1, F_pad), lambda i: (0, 0)),        # b1 (resident)
            pl.BlockSpec((1, F_pad), lambda i: (0, 0)),        # w2 row (resident)
            pl.BlockSpec(memory_space=pltpu.MemorySpace.SMEM), # b2 scalar
        ],
        out_specs=pl.BlockSpec((G_pad, F_pad), lambda i: (0, 0)),
        scratch_shapes=[
            pltpu.VMEM((1, G_pad), jnp.float32),       # running per-graph max
            pltpu.VMEM((1, G_pad), jnp.float32),       # running per-graph sum
            pltpu.VMEM((G_pad, F_pad), jnp.float32),   # running weighted-sum accumulator
        ],
    )

    out = pl.pallas_call(
        _aggregate_kernel,
        out_shape=jax.ShapeDtypeStruct((G_pad, F_pad), jnp.float32),
        grid_spec=grid_spec,
        compiler_params=pltpu.CompilerParams(dimension_semantics=("arbitrary",)),
    )(xp, bcol, brow, w1p, b1p, w2row, b2a)

    return out[:G, :F]


def _reference(x, batch, num_graphs, w1, b1, w2, b2):
    """Pure-JAX reference mirroring the PyTorch forward."""
    h = jnp.maximum(x @ w1 + b1, 0.0)
    gate = h @ w2 + b2                                                  # [N, 1]
    onehot = (batch[:, None] == jnp.arange(num_graphs)[None, :]).astype(jnp.float32)
    seg_max = jnp.max(jnp.where(onehot > 0, gate, -1e30), axis=0)       # [G]
    e = jnp.exp(gate[:, 0] - seg_max[batch])                            # [N]
    seg_sum = jax.ops.segment_sum(e, batch, num_segments=num_graphs)    # [G]
    gate_n = e / (seg_sum[batch] + 1e-16)                               # [N]
    return jax.ops.segment_sum(gate_n[:, None] * x, batch, num_segments=num_graphs)


if __name__ == "__main__":
    N, F, G = 300, 32, 3   # 300 basic blocks, feature size 32, 3 graphs

    key = jax.random.PRNGKey(0)
    k1, k2, k3, k4, k5, k6 = jax.random.split(key, 6)

    # Deterministic synthetic parameters (Linear(size,size) and Linear(size,1)).
    w1 = jax.random.normal(k1, (F, F), jnp.float32) * 0.1     # [in, out]
    b1 = jax.random.normal(k2, (1, F), jnp.float32) * 0.1
    w2 = jax.random.normal(k3, (F, 1), jnp.float32) * 0.1
    b2 = jax.random.normal(k4, (1, 1), jnp.float32) * 0.1

    # Node features and bb_batch assignment (unsorted graph ids).
    x = jax.random.normal(k5, (N, F), jnp.float32)
    batch = jax.random.randint(k6, (N,), 0, G, dtype=jnp.int32)

    # tile_n=128 exercises multi-tile online softmax + row/feature/graph padding.
    out = basic_block_to_graph_aggregate(x, batch, G, w1, b1, w2, b2, tile_n=128)
    out = jax.block_until_ready(out)

    ref = _reference(x, batch, G, w1, b1, w2, b2)
    assert out.shape == (G, F)
    assert jnp.allclose(out, ref, atol=1e-5, rtol=1e-5), "mismatch vs reference"

    print("KERNEL_OK")
</pallas_src>

<mosaic_0001>
module attributes {stable_mosaic.version = 11 : i64} {
  func.func @_aggregate_kernel(%arg0: i32, %arg1: memref<128x128xf32, #tpu.memory_space<vmem>>, %arg2: memref<128x1xi32, #tpu.memory_space<vmem>>, %arg3: memref<1x128xi32, #tpu.memory_space<vmem>>, %arg4: memref<128x128xf32, #tpu.memory_space<vmem>>, %arg5: memref<1x128xf32, #tpu.memory_space<vmem>>, %arg6: memref<1x128xf32, #tpu.memory_space<vmem>>, %arg7: memref<1x1xf32, #tpu.memory_space<smem>>, %arg8: memref<8x128xf32, #tpu.memory_space<vmem>>, %arg9: memref<1x8xf32, #tpu.memory_space<vmem>>, %arg10: memref<1x8xf32, #tpu.memory_space<vmem>>, %arg11: memref<8x128xf32, #tpu.memory_space<vmem>>) attributes {dimension_semantics = [#tpu.dimension_semantics<arbitrary>], iteration_bounds = array<i64: 3>, scalar_prefetch = 0 : i64, scratch_operands = 3 : i64, tpu.core_type = #tpu.core_type<tc>, window_params = [{transform_indices = @transform_0, window_bounds = array<i64: 128, 128>}, {transform_indices = @transform_1, window_bounds = array<i64: 128, 1>}, {transform_indices = @transform_2, window_bounds = array<i64: 1, 128>}, {pipeline_mode = #tpu.pipeline_mode<synchronous>, transform_indices = @transform_3, window_bounds = array<i64: 128, 128>}, {pipeline_mode = #tpu.pipeline_mode<synchronous>, transform_indices = @transform_4, window_bounds = array<i64: 1, 128>}, {pipeline_mode = #tpu.pipeline_mode<synchronous>, transform_indices = @transform_5, window_bounds = array<i64: 1, 128>}, {transform_indices = @transform_6, window_bounds = array<i64: 1, 1>}, {pipeline_mode = #tpu.pipeline_mode<synchronous>, transform_indices = @transform_7, window_bounds = array<i64: 8, 128>}]} {
    %c0_i32 = arith.constant 0 : i32
    %0 = arith.cmpi eq, %arg0, %c0_i32 : i32
    %1 = arith.extui %0 : i1 to i32
    %cst = arith.constant -1.000000e+30 : f32
    %c0_i32_0 = arith.constant 0 : i32
    %2 = arith.cmpi ne, %1, %c0_i32_0 : i32
    scf.if %2 {
      %82 = vector.broadcast %cst : f32 to vector<1x8xf32>
      %c0_40 = arith.constant 0 : index
      %c0_41 = arith.constant 0 : index
      %83 = vector.load %arg9[%c0_40, %c0_41] : memref<1x8xf32, #tpu.memory_space<vmem>>, vector<1x8xf32>
      tpu.vector_store %arg9[%c0_40, %c0_41], %82 {strides = array<i32>} : memref<1x8xf32, #tpu.memory_space<vmem>>, vector<1x8xf32>,
      %cst_42 = arith.constant 0.000000e+00 : f32
      %84 = vector.broadcast %cst_42 : f32 to vector<1x8xf32>
      %c0_43 = arith.constant 0 : index
      %c0_44 = arith.constant 0 : index
      %85 = vector.load %arg10[%c0_43, %c0_44] : memref<1x8xf32, #tpu.memory_space<vmem>>, vector<1x8xf32>
      tpu.vector_store %arg10[%c0_43, %c0_44], %84 {strides = array<i32>} : memref<1x8xf32, #tpu.memory_space<vmem>>, vector<1x8xf32>,
      %cst_45 = arith.constant 0.000000e+00 : f32
      %86 = vector.broadcast %cst_45 : f32 to vector<8x128xf32>
      %c0_46 = arith.constant 0 : index
      %c0_47 = arith.constant 0 : index
      %87 = vector.load %arg11[%c0_46, %c0_47] : memref<8x128xf32, #tpu.memory_space<vmem>>, vector<8x128xf32>
      tpu.vector_store %arg11[%c0_46, %c0_47], %86 {strides = array<i32>} : memref<8x128xf32, #tpu.memory_space<vmem>>, vector<8x128xf32>,
    } else {
    }
    %c0 = arith.constant 0 : index
    %c0_1 = arith.constant 0 : index
    %3 = vector.load %arg1[%c0, %c0_1] : memref<128x128xf32, #tpu.memory_space<vmem>>, vector<128x128xf32>
    %c0_2 = arith.constant 0 : index
    %c0_3 = arith.constant 0 : index
    %4 = vector.load %arg2[%c0_2, %c0_3] : memref<128x1xi32, #tpu.memory_space<vmem>>, vector<128x1xi32>
    %c0_4 = arith.constant 0 : index
    %c0_5 = arith.constant 0 : index
    %5 = vector.load %arg3[%c0_4, %c0_5] : memref<1x128xi32, #tpu.memory_space<vmem>>, vector<1x128xi32>
    %c0_6 = arith.constant 0 : index
    %c0_7 = arith.constant 0 : index
    %6 = vector.load %arg4[%c0_6, %c0_7] : memref<128x128xf32, #tpu.memory_space<vmem>>, vector<128x128xf32>
    %cst_8 = arith.constant dense<0.000000e+00> : vector<128x128xf32>
    %7 = tpu.matmul %3, %6, %cst_8 {dimension_numbers = #tpu.dot_dimension_numbers<[1], [0], [0], [1], [0, 0, 1, 1], [], []>} : vector<128x128xf32>, vector<128x128xf32>, vector<128x128xf32> -> vector<128x128xf32>
    %c0_9 = arith.constant 0 : index
    %c0_10 = arith.constant 0 : index
    %8 = vector.load %arg5[%c0_9, %c0_10] : memref<1x128xf32, #tpu.memory_space<vmem>>, vector<1x128xf32>
    %9 = vector.broadcast %8 : vector<1x128xf32> to vector<128x128xf32>
    %10 = arith.addf %7, %9 : vector<128x128xf32>
    %cst_11 = arith.constant 0.000000e+00 : f32
    %11 = vector.broadcast %cst_11 : f32 to vector<128x128xf32>
    %12 = arith.maximumf %10, %11 : vector<128x128xf32>
    %c0_12 = arith.constant 0 : index
    %c0_13 = arith.constant 0 : index
    %13 = vector.load %arg6[%c0_12, %c0_13] : memref<1x128xf32, #tpu.memory_space<vmem>>, vector<1x128xf32>
    %14 = vector.broadcast %13 : vector<1x128xf32> to vector<128x128xf32>
    %15 = arith.mulf %12, %14 : vector<128x128xf32>
    %cst_14 = arith.constant dense<0.000000e+00> : vector<128xf32>
    %16 = vector.multi_reduction <add>, %15, %cst_14 [1] : vector<128x128xf32> to vector<128xf32>
    %17 = vector.shape_cast %16 : vector<128xf32> to vector<128x1xf32>
    %c0_15 = arith.constant 0 : index
    %c0_16 = arith.constant 0 : index
    %18 = memref.load %arg7[%c0_15, %c0_16] : memref<1x1xf32, #tpu.memory_space<smem>>
    %19 = vector.broadcast %18 : f32 to vector<128x1xf32>
    %20 = arith.addf %17, %19 : vector<128x1xf32>
    %c8_i32 = arith.constant 8 : i32
    %21 = vector.broadcast %c8_i32 : i32 to vector<128x1xi32>
    %22 = arith.cmpi slt, %4, %21 : vector<128x1xi32>
    %cst_17 = arith.constant -1.000000e+30 : f32
    %23 = vector.broadcast %cst_17 : f32 to vector<128x1xf32>
    %24 = arith.select %22, %20, %23 : vector<128x1xi1>, vector<128x1xf32>
    %25 = tpu.iota {dimensions = array<i32: 1>} : vector<128x8xi32>
    %26 = vector.broadcast %4 : vector<128x1xi32> to vector<128x8xi32>
    %27 = arith.cmpi eq, %25, %26 : vector<128x8xi32>
    %cst_18 = arith.constant -1.000000e+30 : f32
    %28 = vector.shape_cast %24 : vector<128x1xf32> to vector<128x1xf32>
    %29 = vector.broadcast %28 : vector<128x1xf32> to vector<128x8xf32>
    %30 = vector.broadcast %cst_18 : f32 to vector<128x8xf32>
    %31 = arith.select %27, %29, %30 : vector<128x8xi1>, vector<128x8xf32>
    %cst_19 = arith.constant dense<0xFF800000> : vector<8xf32>
    %32 = vector.multi_reduction <maximumf>, %31, %cst_19 [0] : vector<128x8xf32> to vector<8xf32>
    %33 = vector.shape_cast %32 : vector<8xf32> to vector<1x8xf32>
    %c0_20 = arith.constant 0 : index
    %c0_21 = arith.constant 0 : index
    %34 = vector.load %arg9[%c0_20, %c0_21] : memref<1x8xf32, #tpu.memory_space<vmem>>, vector<1x8xf32>
    %35 = arith.maximumf %34, %33 : vector<1x8xf32>
    %36 = arith.subf %34, %35 : vector<1x8xf32>
    %37 = math.exp %36 : vector<1x8xf32>
    %cst_22 = arith.constant 0.000000e+00 : f32
    %38 = vector.shape_cast %35 : vector<1x8xf32> to vector<1x8xf32>
    %39 = vector.broadcast %38 : vector<1x8xf32> to vector<128x8xf32>
    %40 = vector.broadcast %cst_22 : f32 to vector<128x8xf32>
    %41 = arith.select %27, %39, %40 : vector<128x8xi1>, vector<128x8xf32>
    %cst_23 = arith.constant dense<0.000000e+00> : vector<128xf32>
    %42 = vector.multi_reduction <add>, %41, %cst_23 [1] : vector<128x8xf32> to vector<128xf32>
    %43 = vector.shape_cast %42 : vector<128xf32> to vector<128x1xf32>
    %44 = arith.subf %24, %43 : vector<128x1xf32>
    %45 = math.exp %44 : vector<128x1xf32>
    %cst_24 = arith.constant 0.000000e+00 : f32
    %46 = vector.shape_cast %45 : vector<128x1xf32> to vector<128x1xf32>
    %47 = vector.broadcast %46 : vector<128x1xf32> to vector<128x8xf32>
    %48 = vector.broadcast %cst_24 : f32 to vector<128x8xf32>
    %49 = arith.select %27, %47, %48 : vector<128x8xi1>, vector<128x8xf32>
    %cst_25 = arith.constant dense<0.000000e+00> : vector<8xf32>
    %50 = vector.multi_reduction <add>, %49, %cst_25 [0] : vector<128x8xf32> to vector<8xf32>
    %51 = vector.shape_cast %50 : vector<8xf32> to vector<1x8xf32>
    %c0_26 = arith.constant 0 : index
    %c0_27 = arith.constant 0 : index
    %52 = vector.load %arg10[%c0_26, %c0_27] : memref<1x8xf32, #tpu.memory_space<vmem>>, vector<1x8xf32>
    %53 = arith.mulf %37, %52 : vector<1x8xf32>
    %54 = arith.addf %53, %51 : vector<1x8xf32>
    %c0_28 = arith.constant 0 : index
    %c0_29 = arith.constant 0 : index
    %55 = vector.load %arg10[%c0_28, %c0_29] : memref<1x8xf32, #tpu.memory_space<vmem>>, vector<1x8xf32>
    tpu.vector_store %arg10[%c0_28, %c0_29], %54 {strides = array<i32>} : memref<1x8xf32, #tpu.memory_space<vmem>>, vector<1x8xf32>,
    %c0_30 = arith.constant 0 : index
    %c0_31 = arith.constant 0 : index
    %56 = vector.load %arg9[%c0_30, %c0_31] : memref<1x8xf32, #tpu.memory_space<vmem>>, vector<1x8xf32>
    tpu.vector_store %arg9[%c0_30, %c0_31], %35 {strides = array<i32>} : memref<1x8xf32, #tpu.memory_space<vmem>>, vector<1x8xf32>,
    %57 = tpu.iota {dimensions = array<i32: 0>} : vector<8x128xi32>
    %58 = vector.broadcast %5 : vector<1x128xi32> to vector<8x128xi32>
    %59 = arith.cmpi eq, %57, %58 : vector<8x128xi32>
    %60 = arith.extui %59 : vector<8x128xi1> to vector<8x128xi32>
    %61 = arith.sitofp %60 : vector<8x128xi32> to vector<8x128xf32>
    %62 = vector.broadcast %45 : vector<128x1xf32> to vector<128x128xf32>
    %63 = arith.mulf %62, %3 : vector<128x128xf32>
    %cst_32 = arith.constant dense<0.000000e+00> : vector<8x128xf32>
    %64 = tpu.matmul %61, %63, %cst_32 {dimension_numbers = #tpu.dot_dimension_numbers<[1], [0], [0], [1], [0, 0, 1, 1], [], []>} : vector<8x128xf32>, vector<128x128xf32>, vector<8x128xf32> -> vector<8x128xf32>
    %65 = tpu.iota {dimensions = array<i32: 0>} : vector<8x8xi32>
    %66 = tpu.iota {dimensions = array<i32: 1>} : vector<8x8xi32>
    %67 = arith.cmpi eq, %65, %66 : vector<8x8xi32>
    %cst_33 = arith.constant 0.000000e+00 : f32
    %68 = vector.shape_cast %37 : vector<1x8xf32> to vector<1x8xf32>
    %69 = vector.broadcast %68 : vector<1x8xf32> to vector<8x8xf32>
    %70 = vector.broadcast %cst_33 : f32 to vector<8x8xf32>
    %71 = arith.select %67, %69, %70 : vector<8x8xi1>, vector<8x8xf32>
    %cst_34 = arith.constant dense<0.000000e+00> : vector<8xf32>
    %72 = vector.multi_reduction <add>, %71, %cst_34 [1] : vector<8x8xf32> to vector<8xf32>
    %73 = vector.shape_cast %72 : vector<8xf32> to vector<8x1xf32>
    %c0_35 = arith.constant 0 : index
    %c0_36 = arith.constant 0 : index
    %74 = vector.load %arg11[%c0_35, %c0_36] : memref<8x128xf32, #tpu.memory_space<vmem>>, vector<8x128xf32>
    %75 = vector.broadcast %73 : vector<8x1xf32> to vector<8x128xf32>
    %76 = arith.mulf %75, %74 : vector<8x128xf32>
    %77 = arith.addf %76, %64 : vector<8x128xf32>
    %c0_37 = arith.constant 0 : index
    %c0_38 = arith.constant 0 : index
    %78 = vector.load %arg11[%c0_37, %c0_38] : memref<8x128xf32, #tpu.memory_space<vmem>>, vector<8x128xf32>
    tpu.vector_store %arg11[%c0_37, %c0_38], %77 {strides = array<i32>} : memref<8x128xf32, #tpu.memory_space<vmem>>, vector<8x128xf32>,
    %c2_i32 = arith.constant 2 : i32
    %79 = arith.cmpi eq, %arg0, %c2_i32 : i32
    %80 = arith.extui %79 : i1 to i32
    %c0_i32_39 = arith.constant 0 : i32
    %81 = arith.cmpi ne, %80, %c0_i32_39 : i32
    scf.if %81 {
      %c0_40 = arith.constant 0 : index
      %c0_41 = arith.constant 0 : index
      %82 = vector.load %arg10[%c0_40, %c0_41] : memref<1x8xf32, #tpu.memory_space<vmem>>, vector<1x8xf32>
      %cst_42 = arith.constant 1.000000e-16 : f32
      %83 = vector.broadcast %cst_42 : f32 to vector<1x8xf32>
      %84 = arith.addf %82, %83 : vector<1x8xf32>
      %85 = tpu.reciprocal %84 : vector<1x8xf32> -> vector<1x8xf32>
      %cst_43 = arith.constant 0.000000e+00 : f32
      %86 = vector.shape_cast %85 : vector<1x8xf32> to vector<1x8xf32>
      %87 = vector.broadcast %86 : vector<1x8xf32> to vector<8x8xf32>
      %88 = vector.broadcast %cst_43 : f32 to vector<8x8xf32>
      %89 = arith.select %67, %87, %88 : vector<8x8xi1>, vector<8x8xf32>
      %cst_44 = arith.constant dense<0.000000e+00> : vector<8xf32>
      %90 = vector.multi_reduction <add>, %89, %cst_44 [1] : vector<8x8xf32> to vector<8xf32>
      %91 = vector.shape_cast %90 : vector<8xf32> to vector<8x1xf32>
      %c0_45 = arith.constant 0 : index
      %c0_46 = arith.constant 0 : index
      %92 = vector.load %arg11[%c0_45, %c0_46] : memref<8x128xf32, #tpu.memory_space<vmem>>, vector<8x128xf32>
      %93 = vector.broadcast %91 : vector<8x1xf32> to vector<8x128xf32>
      %94 = arith.mulf %92, %93 : vector<8x128xf32>
      %c0_47 = arith.constant 0 : index
      %c0_48 = arith.constant 0 : index
      %95 = vector.load %arg8[%c0_47, %c0_48] : memref<8x128xf32, #tpu.memory_space<vmem>>, vector<8x128xf32>
      tpu.vector_store %arg8[%c0_47, %c0_48], %94 {strides = array<i32>} : memref<8x128xf32, #tpu.memory_space<vmem>>, vector<8x128xf32>,
    } else {
    }
    return
  }
  func.func @transform_0(%arg0: i32) -> (i32, i32) {
    %c0_i32 = arith.constant 0 : i32
    %c0_i32_0 = arith.constant 0 : i32
    return %arg0, %c0_i32 : i32, i32
  }
  func.func @transform_1(%arg0: i32) -> (i32, i32) {
    %c0_i32 = arith.constant 0 : i32
    %c0_i32_0 = arith.constant 0 : i32
    return %arg0, %c0_i32 : i32, i32
  }
  func.func @transform_2(%arg0: i32) -> (i32, i32) {
    %c0_i32 = arith.constant 0 : i32
    %c0_i32_0 = arith.constant 0 : i32
    return %c0_i32, %arg0 : i32, i32
  }
  func.func @transform_3(%arg0: i32) -> (i32, i32) {
    %c0_i32 = arith.constant 0 : i32
    %c0_i32_0 = arith.constant 0 : i32
    %c0_i32_1 = arith.constant 0 : i32
    return %c0_i32, %c0_i32_0 : i32, i32
  }
  func.func @transform_4(%arg0: i32) -> (i32, i32) {
    %c0_i32 = arith.constant 0 : i32
    %c0_i32_0 = arith.constant 0 : i32
    %c0_i32_1 = arith.constant 0 : i32
    return %c0_i32, %c0_i32_0 : i32, i32
  }
  func.func @transform_5(%arg0: i32) -> (i32, i32) {
    %c0_i32 = arith.constant 0 : i32
    %c0_i32_0 = arith.constant 0 : i32
    %c0_i32_1 = arith.constant 0 : i32
    return %c0_i32, %c0_i32_0 : i32, i32
  }
  func.func @transform_6(%arg0: i32) -> (i32, i32) {
    %c0_i32 = arith.constant 0 : i32
    %c0_i32_0 = arith.constant 0 : i32
    %c0_i32_1 = arith.constant 0 : i32
    return %c0_i32, %c0_i32_0 : i32, i32
  }
  func.func @transform_7(%arg0: i32) -> (i32, i32) {
    %c0_i32 = arith.constant 0 : i32
    %c0_i32_0 = arith.constant 0 : i32
    %c0_i32_1 = arith.constant 0 : i32
    return %c0_i32, %c0_i32_0 : i32, i32
  }
}

</mosaic_0001>

<bundles_post_ra>
// kernel: basic_block_to_graph_aggregate.1
= control target key start
LH: loop header
LB: loop body
LE: loop exit
PB: predicated region body
PF: predicated region fallthrough
CT: control target
= control target key end

     0   :  { %s1297_s26 = smov 0   ;;  %s1977_s0 = inlined_call_operand.vmem [shape: f32[384,128], index: 0, kind: input, shape index: {}]   ;;  %s1978_s1 = inlined_call_operand.vmem [shape: s32[384,1], index: 1, kind: input, shape index: {}]   ;;  %s1979_s2 = inlined_call_operand.vmem [shape: s32[1,384], index: 2, kind: input, shape index: {}]   ;;  %s1980_s3 = inlined_call_operand.vmem [shape: f32[128,128], index: 3, kind: input, shape index: {}]   ;;  %s1981_s4 = inlined_call_operand.vmem [shape: f32[1,128], index: 4, kind: input, shape index: {}]   ;;  %s1982_s5 = inlined_call_operand.vmem [shape: f32[1,128], index: 5, kind: input, shape index: {}]   ;;  %s1983_s6 = inlined_call_operand.<no memory space> [shape: f32[1,1], index: 6, kind: input, shape index: {}]   ;;  %s1984_s7 = inlined_call_operand.vmem [shape: f32[8,128], index: 7, kind: output, shape index: {}]  }
   0x1   :  { %12 = sst [smem:[#allocation5]] %s1983_s6 }
   0x2 LB: > { %s1303_s27 = sadd.s32 4294967295, %s1248_s26   ;;  %p1142_p0 = scmp.ge.s32.totalorder %s1248_s26, 1  ;;  %s1248_s26 = sphi %s1297_s26, %s18_s26  }
   0x3   : > { %p253_p1 = scmp.lt.s32.totalorder %s1248_s26, 4 }
   0x5   : > { %p254_p2 = pnand %p1142_p0, %p253_p1 }
   0x7   : > { %257 = sbr.rel (%p254_p2) target bundleno = 1053 (0x41d), region = 48 }
   0xc   : > { %s1143_s6 = sshll.u32 %s1303_s27, 4  ;;  %p300_p3 = scmp.lt.s32.totalorder %s1303_s27, 2 }
   0xd   : > { %p289_p4 = scmp.lt.s32.totalorder %s1143_s6, 47  ;;  %p1147_p5 = scmp.ne.s32.totalorder %s1303_s27, 0 }
   0xe   : > { %s1310_s28 = scalar_select %p300_p3, %s1303_s27, 2 }
   0xf   : > { %s2023_s6 = smov (!%p289_p4, %s1143_s6), 47  ;;  %306 = sbr.rel (%p1147_p5) target bundleno = 24 (0x18), region = 52 }
  0x10   : > { %s302_s8 = scalar_lea.vmem %s1979_s2, %s1310_s28  ;;  %s1144_s9 = sshll.u32 %s2023_s6, 3 }
  0x11   : > { %s1319_s12 = scalar_lea.vmem %s1977_s0, %s1144_s9  ;;  %s1324_s15 = scalar_lea.vmem %s1978_s1, %s1144_s9 }
  0x14   : > { %vm307_vm0 = vcmask 57344   ;;  %v1250_v0 = vmov -1e+30   ;;  %v1251_v1 = vmov 0.0  }
  0x15   : > { %308 = vst.msk [vmem:[#allocation2] sm:$0x1] %vm307_vm0, %v1250_v0 }
  0x16   : > { %309 = vst.msk [vmem:[#allocation3] sm:$0x1] %vm307_vm0, %v1251_v1 }
  0x17   : > { %310 = vst [vmem:[#allocation4] sm:$0xff] %v1251_v1 }
  0x18 PF: > { %v359_v2 = vld [vmem:[%s1980_s3 + $0x78] sm:$0xff]  ;;  %v358_v3 = vld [vmem:[%s1980_s3 + $0x70] sm:$0xff]  ;;  %v357_v4 = vld [vmem:[%s1980_s3 + $0x68] sm:$0xff]  ;;  %v1252_v9 = vmov 0   ;;  %s497_s14 = sld [smem:[#allocation5]]  ;;  %p1150_p6 = scmp.ne.s32.totalorder %s1303_s27, 2 }
  0x19   : > { %364 = vmatpush.msra.mxu0 %v359_v2  ;;  %1153 = vmatpush.msra.mxu2 %v359_v2  ;;  %v356_v5 = vld [vmem:[%s1980_s3 + $0x60] sm:$0xff]  ;;  %v355_v6 = vld [vmem:[%s1980_s3 + $0x58] sm:$0xff]  ;;  %v354_v7 = vld [vmem:[%s1980_s3 + $0x50] sm:$0xff] }
  0x1a   : > { %1154 = vmatpush.msra.mxu3 %v359_v2  ;;  %v353_v8 = vld [vmem:[%s1980_s3 + $0x48] sm:$0xff]  ;;  %1198 = vset.pattern.permute.xlu2 %v1252_v9  ;;  %v352_v10 = vld [vmem:[%s1980_s3 + $0x40] sm:$0xff]  ;;  %v351_v11 = vld [vmem:[%s1980_s3 + $0x38] sm:$0xff] }
  0x1b   : > { %365 = vmatpush.msra.mxu0 %v358_v3  ;;  %1155 = vmatpush.msra.mxu2 %v358_v3  ;;  %v350_v12 = vld [vmem:[%s1980_s3 + $0x30] sm:$0xff]  ;;  %v1358_v13 = vld [vmem:[%s1324_s15 + $0x8] sm:$0xff]  ;;  %v1361_v14 = vld [vmem:[%s1324_s15] sm:$0xff] }
  0x1c   : > { %1156 = vmatpush.msra.mxu3 %v358_v3  ;;  %1197 = vset.pattern.permute.xlu1 %v1252_v9  ;;  %v349_v15 = vld [vmem:[%s1980_s3 + $0x28] sm:$0xff]  ;;  %v348_v16 = vld [vmem:[%s1980_s3 + $0x20] sm:$0xff]  ;;  %v347_v17 = vld [vmem:[%s1980_s3 + $0x18] sm:$0xff]  ;;  %vm515_vm1 = vcmp.lt.s32.totalorder %v1361_v14, 8  ;;  %vm516_vm5 = vcmp.lt.s32.totalorder %v1358_v13, 8 }
  0x1d   : > { %366 = vmatpush.msra.mxu0 %v357_v4  ;;  %1157 = vmatpush.msra.mxu2 %v357_v4  ;;  %v346_v18 = vld [vmem:[%s1980_s3 + $0x10] sm:$0xff]  ;;  %v1378_v19 = vld [vmem:[%s1324_s15 + $0x18] sm:$0xff]  ;;  %v1381_v20 = vld [vmem:[%s1324_s15 + $0x20] sm:$0xff] }
  0x1e   : > { %1158 = vmatpush.msra.mxu3 %v357_v4  ;;  %1199 = vset.pattern.permute.xlu0 %v1252_v9  ;;  %v345_v21 = vld [vmem:[%s1980_s3 + $0x8] sm:$0xff]  ;;  %v344_v22 = vld [vmem:[%s1980_s3] sm:$0xff]  ;;  %v1401_v27 = vld [vmem:[%s1324_s15 + $0x30] sm:$0xff]  ;;  %vm519_vm2 = vcmp.lt.s32.totalorder %v1381_v20, 8  ;;  %vm518_vm10 = vcmp.lt.s32.totalorder %v1378_v19, 8 }
  0x1f   : > { %367 = vmatpush.msra.mxu0 %v356_v5  ;;  %1159 = vmatpush.msra.mxu2 %v356_v5  ;;  %v311_v23 = vld [vmem:[%s1319_s12] sm:$0xff]  ;;  %v1394_v25 = vld [vmem:[%s1319_s12 + $0x48] sm:$0xff]  ;;  %v1410_v30 = vld [vmem:[%s1319_s12 + $0x50] sm:$0xff]  ;;  %vm521_vm8 = vcmp.lt.s32.totalorder %v1401_v27, 8 }
  0x20   : > { %1160 = vmatpush.msra.mxu3 %v356_v5  ;;  %553 = vperm.xlu2 %1198, %v1358_v13   ;;  %v315_v24 = vld [vmem:[%s1319_s12 + $0x20] sm:$0xff]  ;;  %1999 = vst [vmem:[#allocation6_spill] sm:$0xff] %v1394_v25  ;;  %v1398_v26 = vld [vmem:[%s1324_s15 + $0x28] sm:$0xff]  ;;  %v1415_v31 = vld [vmem:[%s1324_s15 + $0x38] sm:$0xff] }
  0x21   : > { %368 = vmatpush.msra.mxu0 %v355_v6  ;;  %1161 = vmatpush.msra.mxu2 %v355_v6  ;;  %v312_v28 = vld [vmem:[%s1319_s12 + $0x8] sm:$0xff]  ;;  %v1418_v32 = vld [vmem:[%s1324_s15 + $0x10] sm:$0xff]  ;;  %v1421_v33 = vld [vmem:[%s1324_s15 + $0x40] sm:$0xff]  ;;  %vm520_vm4 = vcmp.lt.s32.totalorder %v1398_v26, 8  ;;  %vm522_vm12 = vcmp.lt.s32.totalorder %v1415_v31, 8 }
  0x22   : > { %1162 = vmatpush.msra.mxu3 %v355_v6  ;;  %550 = vperm.xlu1 %1197, %v1361_v14   ;;  %v1407_v29 = vld [vmem:[%s1319_s12 + $0x28] sm:$0xff]  ;;  %v1427_v34 = vld [vmem:[%s1319_s12 + $0x10] sm:$0xff]  ;;  %v1433_v36 = vld [vmem:[%s1319_s12 + $0x58] sm:$0xff]  ;;  %vm517_vm6 = vcmp.lt.s32.totalorder %v1418_v32, 8  ;;  %vm523_vm11 = vcmp.lt.s32.totalorder %v1421_v33, 8 }
  0x23   : > { %369 = vmatpush.msra.mxu0 %v354_v7  ;;  %1163 = vmatpush.msra.mxu2 %v354_v7  ;;  %2000 = vst [vmem:[#allocation7_spill] sm:$0xff] %v1407_v29  ;;  %v1430_v35 = vld [vmem:[%s1319_s12 + $0x30] sm:$0xff]  ;;  %v1439_v37 = vld [vmem:[%s1324_s15 + $0x58] sm:$0xff]  ;;  %v1445_v39 = vld [vmem:[%s1324_s15 + $0x48] sm:$0xff] }
  0x24   : > { %1164 = vmatpush.msra.mxu3 %v354_v7  ;;  %556 = vperm.xlu0 %1199, %v1418_v32   ;;  %2001 = vst [vmem:[#allocation8_spill] sm:$0xff] %v1427_v34  ;;  %v1442_v38 = vld [vmem:[%s1324_s15 + $0x50] sm:$0xff]  ;;  %v1451_v40 = vld [vmem:[%s1319_s12 + $0x18] sm:$0xff]  ;;  %v1457_v42 = vld [vmem:[%s1319_s12 + $0x60] sm:$0xff]  ;;  %vm524_vm3 = vcmp.lt.s32.totalorder %v1445_v39, 8  ;;  %vm526_vm9 = vcmp.lt.s32.totalorder %v1439_v37, 8 }
  0x25   : > { %370 = vmatpush.msra.mxu0 %v353_v8  ;;  %1165 = vmatpush.msra.mxu2 %v353_v8  ;;  %2002 = vst [vmem:[#allocation9_spill] sm:$0xff] %v1430_v35  ;;  %v1454_v41 = vld [vmem:[%s1319_s12 + $0x38] sm:$0xff]  ;;  %v1460_v43 = vld [vmem:[%s1324_s15 + $0x68] sm:$0xff]  ;;  %v1463_v44 = vld [vmem:[%s1324_s15 + $0x60] sm:$0xff]  ;;  %vm525_vm7 = vcmp.lt.s32.totalorder %v1442_v38, 8 }
  0x26   : > { %1166 = vmatpush.msra.mxu3 %v353_v8  ;;  %2003 = vst [vmem:[#allocation10_spill] sm:$0xff] %v1451_v40  ;;  %v1469_v45 = vld [vmem:[%s1324_s15 + $0x70] sm:$0xff]  ;;  %v1475_v46 = vld [vmem:[%s1319_s12 + $0x40] sm:$0xff]  ;;  %v1478_v47 = vld [vmem:[%s1319_s12 + $0x68] sm:$0xff]  ;;  %vm528_vm13 = vcmp.lt.s32.totalorder %v1460_v43, 8  ;;  %vm527_vm15 = vcmp.lt.s32.totalorder %v1463_v44, 8 }
  0x27   : > { %371 = vmatpush.msra.mxu0 %v352_v10  ;;  %1167 = vmatpush.msra.mxu2 %v352_v10  ;;  %2004 = vst [vmem:[#allocation11_spill] sm:$0xff] %v1454_v41  ;;  %v1481_v48 = vld [vmem:[%s1324_s15 + $0x78] sm:$0xff]  ;;  %v1487_v49 = vld [vmem:[%s1319_s12 + $0x70] sm:$0xff]  ;;  %v1497_v51 = vld [vmem:[%s1981_s4] ss:$0 sm:$0xff]  ;;  %vm529_vm14 = vcmp.lt.s32.totalorder %v1469_v45, 8 }
  0x28   : > { %1168 = vmatpush.msra.mxu3 %v352_v10  ;;  %559 = vperm.xlu2 %1198, %v1378_v19   ;;  %2005 = vst [vmem:[#allocation12_spill] sm:$0xff] %v1475_v46  ;;  %v1491_v50 = vld [vmem:[%s1319_s12 + $0x78] sm:$0xff]  ;;  %v1503_v54 = vld [vmem:[%s1982_s5] ss:$0 sm:$0xff]  ;;  %vm530_vm0 = vcmp.lt.s32.totalorder %v1481_v48, 8 }
  0x29   : > { %372 = vmatpush.msra.mxu0 %v351_v11  ;;  %1169 = vmatpush.msra.mxu2 %v351_v11 }
  0x2a   : > { %1170 = vmatpush.msra.mxu3 %v351_v11  ;;  %562 = vperm.xlu1 %1197, %v1381_v20  }
  0x2b   : > { %373 = vmatpush.msra.mxu0 %v350_v12  ;;  %1171 = vmatpush.msra.mxu2 %v350_v12 }
  0x2c   : > { %1172 = vmatpush.msra.mxu3 %v350_v12  ;;  %580 = vperm.xlu0 %1199, %v1442_v38  }
  0x2d   : > { %374 = vmatpush.msra.mxu0 %v349_v15  ;;  %1173 = vmatpush.msra.mxu2 %v349_v15 }
  0x2e   : > { %1174 = vmatpush.msra.mxu3 %v349_v15 }
  0x2f   : > { %375 = vmatpush.msra.mxu0 %v348_v16  ;;  %1175 = vmatpush.msra.mxu2 %v348_v16 }
  0x30   : > { %1176 = vmatpush.msra.mxu3 %v348_v16  ;;  %565 = vperm.xlu2 %1198, %v1398_v26  }
  0x31   : > { %376 = vmatpush.msra.mxu0 %v347_v17  ;;  %1177 = vmatpush.msra.mxu2 %v347_v17 }
  0x32   : > { %1178 = vmatpush.msra.mxu3 %v347_v17  ;;  %568 = vperm.xlu1 %1197, %v1401_v27  }
  0x33   : > { %377 = vmatpush.msra.mxu0 %v346_v18  ;;  %1179 = vmatpush.msra.mxu2 %v346_v18 }
  0x34   : > { %1180 = vmatpush.msra.mxu3 %v346_v18  ;;  %586 = vperm.xlu0 %1199, %v1463_v44  }
  0x35   : > { %378 = vmatpush.msra.mxu0 %v345_v21  ;;  %1181 = vmatpush.msra.mxu2 %v345_v21 }
  0x36   : > { %1182 = vmatpush.msra.mxu3 %v345_v21 }
  0x37   : > { %379 = vmatpush.msra.mxu0 %v344_v22  ;;  %1183 = vmatpush.msra.mxu2 %v344_v22 }
  0x38   : > { %1184 = vmatpush.msra.mxu3 %v344_v22  ;;  %380 = vmatmul.f32.vlgmr.msra.gmra.mxu0 %v311_v23 }
  0x39   : > { %392 = vmatmul.f32.vlgmr.msra.gmra.mxu2 %v315_v24  ;;  %407 = vmatmul.f32.vlgmr.msra.gmra.mxu3 %v1394_v25  ;;  %v1749_v25 = vld [vmem:[#allocation2] sm:$0x1] }
  0x3a   : > { %571 = vperm.xlu2 %1198, %v1415_v31   ;;  %574 = vperm.xlu1 %1197, %v1421_v33  }
  0x3c   : > { %595 = vperm.xlu0 %1199, %v1481_v48  }
  0x40   : > { %383 = vmatmul.f32.gmra.mxu0 %v312_v28 }
  0x41   : > { %395 = vmatmul.f32.gmra.mxu2 %v1407_v29  ;;  %410 = vmatmul.f32.gmra.mxu3 %v1410_v30 }
  0x42   : > { %583 = vperm.xlu2 %1198, %v1439_v37   ;;  %577 = vperm.xlu1 %1197, %v1445_v39  }
  0x48   : > { %386 = vmatmul.f32.gmra.mxu0 %v1427_v34 }
  0x49   : > { %398 = vmatmul.f32.gmra.mxu2 %v1430_v35  ;;  %413 = vmatmul.f32.gmra.mxu3 %v1433_v36 }
  0x4a   : > { %589 = vperm.xlu2 %1198, %v1460_v43   ;;  %592 = vperm.xlu1 %1197, %v1469_v45  }
  0x50   : > { %389 = vmatmul.f32.gmra.mxu0 %v1451_v40 }
  0x51   : > { %401 = vmatmul.f32.gmra.mxu2 %v1454_v41  ;;  %416 = vmatmul.f32.gmra.mxu3 %v1457_v42 }
  0x59   : > { %404 = vmatmul.f32.gmra.mxu2 %v1475_v46  ;;  %419 = vmatmul.f32.gmra.mxu3 %v1478_v47 }
  0x61   : > { %422 = vmatmul.f32.gmra.mxu3 %v1487_v49 }
  0x69   : > { %425 = vmatmul.f32.gmra.mxu3 %v1491_v50 }
  0xb5   : > { %v381_v52 = vpop.f32.mrf.mxu0 }
  0xb6   : > { %v382_v53 = vadd.f32 %v1497_v51, %v381_v52 }
  0xb8   : > { %v429_v55 = vmax.f32 %v382_v53, 0.0 }
  0xba   : > { %v449_v56 = vmul.f32 %v1503_v54, %v429_v55 }
  0xbc   : > { %v393_v57 = vpop.f32.mrf.mxu2  ;;  %v408_v58 = vpop.f32.mrf.mxu3  ;;  %465 = vadd.xlane.f32.xlu0 %v449_v56 }
  0xbd   : > { %v394_v59 = vadd.f32 %v1497_v51, %v393_v57  ;;  %v409_v60 = vadd.f32 %v1497_v51, %v408_v58  ;;  %v384_v61 = vpop.f32.mrf.mxu0 }
  0xbe   : > { %v385_v1 = vadd.f32 %v1497_v51, %v384_v61 }
  0xbf   : > { %v433_v62 = vmax.f32 %v394_v59, 0.0  ;;  %v438_v63 = vmax.f32 %v409_v60, 0.0 }
  0xc0   : > { %v430_v8 = vmax.f32 %v385_v1, 0.0 }
  0xc1   : > { %v453_v0 = vmul.f32 %v1503_v54, %v433_v62  ;;  %v458_v2 = vmul.f32 %v1503_v54, %v438_v63 }
  0xc2   : > { %v450_v16 = vmul.f32 %v1503_v54, %v430_v8 }
  0xc3   : > { %473 = vadd.xlane.f32.xlu2 %v453_v0 }
  0xc4   : > { %v396_v3 = vpop.f32.mrf.mxu2  ;;  %v411_v4 = vpop.f32.mrf.mxu3  ;;  %483 = vadd.xlane.f32.xlu0 %v458_v2 }
  0xc5   : > { %v397_v5 = vadd.f32 %v1497_v51, %v396_v3  ;;  %v412_v6 = vadd.f32 %v1497_v51, %v411_v4  ;;  %v387_v7 = vpop.f32.mrf.mxu0 }
  0xc6   : > { %v388_v11 = vadd.f32 %v1497_v51, %v387_v7 }
  0xc7   : > { %v434_v9 = vmax.f32 %v397_v5, 0.0  ;;  %v439_v10 = vmax.f32 %v412_v6, 0.0 }
  0xc8   : > { %v431_v17 = vmax.f32 %v388_v11, 0.0 }
  0xc9   : > { %v459_v12 = vmul.f32 %v1503_v54, %v439_v10  ;;  %v454_v15 = vmul.f32 %v1503_v54, %v434_v9 }
  0xca   : > { %v451_v53 = vmul.f32 %v1503_v54, %v431_v17 }
  0xcb   : > { %485 = vadd.xlane.f32.xlu1 %v459_v12  ;;  %475 = vadd.xlane.f32.xlu2 %v454_v15 }
  0xcc   : > { %v399_v18 = vpop.f32.mrf.mxu2  ;;  %v414_v21 = vpop.f32.mrf.mxu3  ;;  %467 = vadd.xlane.f32.xlu0 %v450_v16 }
  0xcd   : > { %v400_v22 = vadd.f32 %v1497_v51, %v399_v18  ;;  %v415_v23 = vadd.f32 %v1497_v51, %v414_v21  ;;  %v390_v24 = vpop.f32.mrf.mxu0 }
  0xce   : > { %v391_v55 = vadd.f32 %v1497_v51, %v390_v24  ;;  %v1536_v24 = vpop.permute.xlu2 %553 }
  0xcf   : > { %v435_v28 = vmax.f32 %v400_v22, 0.0  ;;  %v440_v52 = vmax.f32 %v415_v23, 0.0 }
  0xd0   : > { %v432_v58 = vmax.f32 %v391_v55, 0.0 }
  0xd1   : > { %v460_v56 = vmul.f32 %v1503_v54, %v440_v52  ;;  %v455_v57 = vmul.f32 %v1503_v54, %v435_v28  ;;  %v1538_v28 = vpop.permute.xlu1 %550 }
  0xd2   : > { %v452_v63 = vmul.f32 %v1503_v54, %v432_v58 }
  0xd3   : > { %487 = vadd.xlane.f32.xlu2 %v460_v56  ;;  %469 = vadd.xlane.f32.xlu1 %v451_v53  ;;  %v1542_v53 = vpop.permute.xlu0 %556 }
  0xd4   : > { %v402_v59 = vpop.f32.mrf.mxu2  ;;  %v417_v60 = vpop.f32.mrf.mxu3  ;;  %477 = vadd.xlane.f32.xlu0 %v455_v57 }
  0xd5   : > { %v418_v61 = vadd.f32 %v1497_v51, %v417_v60  ;;  %v403_v0 = vadd.f32 %v1497_v51, %v402_v59 }
  0xd6   : > { %v1540_v52 = vpop.permute.xlu2 %559 }
  0xd7   : > { %v441_v62 = vmax.f32 %v418_v61, 0.0  ;;  %v436_v4 = vmax.f32 %v403_v0, 0.0 }
  0xd9   : > { %v461_v1 = vmul.f32 %v1503_v54, %v441_v62  ;;  %v456_v9 = vmul.f32 %v1503_v54, %v436_v4  ;;  %v1544_v55 = vpop.permute.xlu1 %562 }
  0xdb   : > { %471 = vadd.xlane.f32.xlu1 %v452_v63  ;;  %v1548_v57 = vpop.permute.xlu0 %580  ;;  %v1564_v63 = vstv %s497_s14 }
  0xdc   : > { %v405_v2 = vpop.f32.mrf.mxu2  ;;  %v420_v3 = vpop.f32.mrf.mxu3  ;;  %489 = vadd.xlane.f32.xlu0 %v461_v1 }
  0xdd   : > { %v406_v5 = vadd.f32 %v1497_v51, %v405_v2  ;;  %v421_v7 = vadd.f32 %v1497_v51, %v420_v3 }
  0xde   : > { %v1546_v56 = vpop.permute.xlu2 %565 }
  0xdf   : > { %v437_v6 = vmax.f32 %v406_v5, 0.0  ;;  %v442_v11 = vmax.f32 %v421_v7, 0.0 }
  0xe1   : > { %v457_v8 = vmul.f32 %v1503_v54, %v437_v6  ;;  %v462_v17 = vmul.f32 %v1503_v54, %v442_v11  ;;  %v1550_v58 = vpop.permute.xlu1 %568 }
  0xe3   : > { %481 = vadd.xlane.f32.xlu2 %v457_v8  ;;  %479 = vadd.xlane.f32.xlu1 %v456_v9 }
  0xe4   : > { %v423_v10 = vpop.f32.mrf.mxu3 }
  0xe5   : > { %v424_v12 = vadd.f32 %v1497_v51, %v423_v10 }
  0xe7   : > { %v443_v15 = vmax.f32 %v424_v12, 0.0 }
  0xe9   : > { %v463_v16 = vmul.f32 %v1503_v54, %v443_v15  ;;  %v1556_v59 = vpop.permute.xlu1 %574 }
  0xeb   : > { %493 = vadd.xlane.f32.xlu2 %v463_v16  ;;  %491 = vadd.xlane.f32.xlu1 %v462_v17 }
  0xec   : > { %v426_v18 = vpop.f32.mrf.mxu3 }
  0xed   : > { %v427_v21 = vadd.f32 %v1497_v51, %v426_v18  ;;  %v1552_v51 = vpop.permute.xlu2 %571 }
  0xef   : > { %v444_v22 = vmax.f32 %v427_v21, 0.0 }
  0xf1   : > { %v464_v23 = vmul.f32 %v1503_v54, %v444_v22  ;;  %v1554_v54 = vpop.permute.xlu0 %586  ;;  %v1562_v62 = vpop.permute.xlu1 %577 }
  0xf3   : > { %495 = vadd.xlane.f32.xlu0 %v464_v23 }
  0xf5   : > { %v1558_v60 = vpop.permute.xlu2 %583 }
  0xf9   : > { %v1560_v61 = vpop.permute.xlu0 %595  ;;  %v1573_v4 = vpop.permute.xlu1 %592 }
  0xfd   : > { %v1566_v0 = vpop.permute.xlu2 %589 }
 0x12f   : > { %v466_v1 = vpop.xlane.xlu0 %465 }
 0x130   : > { %v499_v2 = vadd.f32 %v1564_v63, %v466_v1 }
 0x132   : > { %v1570_v3 = vsel %vm515_vm1, %v499_v2, -1e+30 }
 0x133   : > { %615 = vperm.xlu0 %1199, %v1570_v3  }
 0x136   : > { %v474_v5 = vpop.xlane.xlu2 %473 }
 0x137   : > { %v503_v6 = vadd.f32 %v1564_v63, %v474_v5  ;;  %v484_v7 = vpop.xlane.xlu0 %483 }
 0x138   : > { %v508_v8 = vadd.f32 %v1564_v63, %v484_v7 }
 0x139   : > { %v1579_v14 = vsel %vm519_vm2, %v503_v6, -1e+30 }
 0x13a   : > { %635 = vperm.xlu2 %1198, %v1579_v14   ;;  %v1582_v9 = vsel %vm524_vm3, %v508_v8, -1e+30 }
 0x13b   : > { %660 = vperm.xlu0 %1199, %v1582_v9  }
 0x13e   : > { %v486_v10 = vpop.xlane.xlu1 %485  ;;  %v476_v11 = vpop.xlane.xlu2 %475 }
 0x13f   : > { %v504_v20 = vadd.f32 %v1564_v63, %v476_v11  ;;  %v468_v12 = vpop.xlane.xlu0 %467  ;;  %v509_v17 = vadd.f32 %v1564_v63, %v486_v10 }
 0x140   : > { %v500_v39 = vadd.f32 %v1564_v63, %v468_v12 }
 0x141   : > { %v1589_v15 = vsel %vm520_vm4, %v504_v20, -1e+30  ;;  %v1604_v1 = vsel %vm525_vm7, %v509_v17, -1e+30 }
 0x142   : > { %640 = vperm.xlu1 %1197, %v1589_v15   ;;  %v1592_v16 = vsel %vm516_vm5, %v500_v39, -1e+30 }
 0x143   : > { %620 = vperm.xlu2 %1198, %v1592_v16  }
 0x146   : > { %v470_v26 = vpop.xlane.xlu1 %469  ;;  %v488_v23 = vpop.xlane.xlu2 %487 }
 0x147   : > { %v501_v13 = vadd.f32 %v1564_v63, %v470_v26  ;;  %v478_v18 = vpop.xlane.xlu0 %477  ;;  %v510_v2 = vadd.f32 %v1564_v63, %v488_v23 }
 0x148   : > { %v505_v21 = vadd.f32 %v1564_v63, %v478_v18 }
 0x149   : > { %v1601_v22 = vsel %vm517_vm6, %v501_v13, -1e+30  ;;  %v1614_v5 = vsel %vm526_vm9, %v510_v2, -1e+30 }
 0x14a   : > { %625 = vperm.xlu1 %1197, %v1601_v22   ;;  %v1606_v32 = vsel %vm521_vm8, %v505_v21, -1e+30  ;;  %vm709_vm8 = vcmask 64512  }
 0x14b   : > { %665 = vperm.xlu2 %1198, %v1604_v1   ;;  %645 = vperm.xlu0 %1199, %v1606_v32  }
 0x14e   : > { %v472_v38 = vpop.xlane.xlu1 %471 }
 0x14f   : > { %v502_v27 = vadd.f32 %v1564_v63, %v472_v38  ;;  %v490_v20 = vpop.xlane.xlu0 %489 }
 0x150   : > { %v511_v12 = vadd.f32 %v1564_v63, %v490_v20  ;;  %v1985_v20 = vlaneseq }
 0x151   : > { %v1617_v6 = vsel %vm518_vm10, %v502_v27, -1e+30 }
 0x152   : > { %670 = vperm.xlu1 %1197, %v1614_v5   ;;  %v1642_v18 = vsel %vm527_vm15, %v511_v12, -1e+30  ;;  %v1651_v12 = vand.u32 127, %v1985_v20 }
 0x153   : > { %630 = vperm.xlu0 %1199, %v1617_v6  }
 0x154   : > { %vm598_vm1 = vcmp.eq.s32.totalorder %v1651_v12, %v1536_v24  ;;  %vm600_vm2 = vcmp.eq.s32.totalorder %v1651_v12, %v1540_v52  ;;  %vm602_vm3 = vcmp.eq.s32.totalorder %v1651_v12, %v1546_v56  ;;  %vm604_vm4 = vcmp.eq.s32.totalorder %v1651_v12, %v1552_v51 }
 0x155   : > { %vm1992_vm5 = vcmp.eq.s32.totalorder %v1651_v12, %v1538_v28  ;;  %vm608_vm6 = vcmp.eq.s32.totalorder %v1651_v12, %v1558_v60  ;;  %vm603_vm7 = vcmp.eq.s32.totalorder %v1651_v12, %v1550_v58  ;;  %vm601_vm9 = vcmp.eq.s32.totalorder %v1651_v12, %v1544_v55 }
 0x156   : > { %v482_v7 = vpop.xlane.xlu2 %481  ;;  %v480_v8 = vpop.xlane.xlu1 %479  ;;  %vm1994_vm10 = vcmp.eq.s32.totalorder %v1651_v12, %v1542_v53  ;;  %vm1996_vm15 = vcmp.eq.s32.totalorder %v1651_v12, %v1560_v61 }
 0x157   : > { %v507_v37 = vadd.f32 %v1564_v63, %v482_v7  ;;  %v506_v10 = vadd.f32 %v1564_v63, %v480_v8 }
 0x159   : > { %v1624_v11 = vsel %vm523_vm11, %v507_v37, -1e+30  ;;  %v1626_v19 = vsel %vm522_vm12, %v506_v10, -1e+30  ;;  %vm605_vm11 = vcmp.eq.s32.totalorder %v1651_v12, %v1556_v59  ;;  %vm607_vm12 = vcmp.eq.s32.totalorder %v1651_v12, %v1548_v57 }
 0x15a   : > { %655 = vperm.xlu1 %1197, %v1624_v11   ;;  %650 = vperm.xlu2 %1198, %v1626_v19  }
 0x15e   : > { %v494_v39 = vpop.xlane.xlu2 %493  ;;  %v492_v17 = vpop.xlane.xlu1 %491 }
 0x15f   : > { %v513_v31 = vadd.f32 %v1564_v63, %v494_v39  ;;  %v512_v33 = vadd.f32 %v1564_v63, %v492_v17 }
 0x161   : > { %v1636_v26 = vsel %vm528_vm13, %v512_v33, -1e+30  ;;  %v1638_v13 = vsel %vm529_vm14, %v513_v31, -1e+30  ;;  %vm606_vm13 = vcmp.eq.s32.totalorder %v1651_v12, %v1562_v62  ;;  %vm609_vm14 = vcmp.eq.s32.totalorder %v1651_v12, %v1554_v54 }
 0x162   : > { %680 = vperm.xlu1 %1197, %v1636_v26   ;;  %685 = vperm.xlu0 %1199, %v1638_v13  }
 0x163   : > { %675 = vperm.xlu2 %1198, %v1642_v18  }
 0x166   : > { %v496_v43 = vpop.xlane.xlu0 %495 }
 0x167   : > { %v514_v45 = vadd.f32 %v1564_v63, %v496_v43 }
 0x169   : > { %v1647_v21 = vsel %vm530_vm0, %v514_v45, -1e+30  ;;  %vm610_vm0 = vcmp.eq.s32.totalorder %v1651_v12, %v1566_v0 }
 0x16b   : > { %690 = vperm.xlu2 %1198, %v1647_v21  }
 0x194   : > { %v636_v44 = vpop.permute.xlu2 %635 }
 0x19d   : > { %v621_v23 = vpop.permute.xlu2 %620 }
 0x1a5   : > { %v616_v2 = vpop.permute.xlu0 %615  ;;  %v666_v38 = vpop.permute.xlu2 %665 }
 0x1a6   : > { %v693_v31 = vsel %vm1992_vm5, %v616_v2, -1e+30  ;;  %v697_v2 = vsel %vm601_vm9, %v636_v44, -1e+30  ;;  %vm1998_vm5 = vcmp.eq.s32.totalorder %v1651_v12, %v1573_v4 }
 0x1a7   : > { %v710_v44 = vsel %vm709_vm8, %v693_v31, -inf  ;;  %v703_v31 = vsel %vm607_vm12, %v666_v38, -1e+30 }
 0x1ad   : > { %v661_v7 = vpop.permute.xlu0 %660 }
 0x1b4   : > { %v641_v27 = vpop.permute.xlu1 %640  ;;  %v651_v8 = vpop.permute.xlu2 %650 }
 0x1b5   : > { %v698_v33 = vsel %vm602_vm3, %v641_v27, -1e+30  ;;  %v700_v43 = vsel %vm604_vm4, %v651_v8, -1e+30  ;;  %v694_v8 = vsel %vm598_vm1, %v621_v23, -1e+30 }
 0x1b6   : > { %v720_v34 = vsel %vm709_vm8, %v700_v43, -inf  ;;  %v714_v23 = vsel %vm709_vm8, %v697_v2, -inf  ;;  %v702_v2 = vsel %vm606_vm13, %v661_v7, -1e+30 }
 0x1b7   : > { %v715_v35 = vmax.f32 %v710_v44, %v714_v23 }
 0x1bc   : > { %v626_v37 = vpop.permute.xlu1 %625 }
 0x1bd   : > { %v646_v10 = vpop.permute.xlu0 %645  ;;  %v676_v39 = vpop.permute.xlu2 %675 }
 0x1be   : > { %v699_v45 = vsel %vm603_vm7, %v646_v10, -1e+30  ;;  %v695_v10 = vsel %vm1994_vm10, %v626_v37, -1e+30  ;;  %v705_v38 = vsel %vm609_vm14, %v676_v39, -1e+30 }
 0x1bf   : > { %v718_v40 = vsel %vm709_vm8, %v699_v45, -inf  ;;  %vm1995_vm10 = vcmask 57344  }
 0x1c4   : > { %v671_v48 = vpop.permute.xlu1 %670 }
 0x1c5   : > { %v631_v63 = vpop.permute.xlu0 %630  ;;  %v704_v37 = vsel %vm608_vm6, %v671_v48, -1e+30  ;;  %v691_v43 = vpop.permute.xlu2 %690 }
 0x1c6   : > { %v696_v17 = vsel %vm600_vm2, %v631_v63, -1e+30 }
 0x1c7   : > { %v713_v27 = vsel %vm709_vm8, %v696_v17, -inf  ;;  %v716_v17 = vsel %vm709_vm8, %v698_v33, -inf  ;;  %v712_v33 = vsel %vm709_vm8, %v695_v10, -inf }
 0x1c8   : > { %v721_v29 = vmax.f32 %v713_v27, %v720_v34  ;;  %v719_v46 = vmax.f32 %v712_v33, %v718_v40  ;;  %v728_v34 = vsel %vm709_vm8, %v704_v37, -inf  ;;  %v726_v40 = vsel %vm709_vm8, %v703_v31, -inf }
 0x1c9   : > { %v724_v27 = vsel %vm709_vm8, %v702_v2, -inf }
 0x1ca   : > { %v729_v48 = vmax.f32 %v721_v29, %v728_v34 }
 0x1cc   : > { %v656_v63 = vpop.permute.xlu1 %655 }
 0x1cd   : > { %v701_v20 = vsel %vm605_vm11, %v656_v63, -1e+30  ;;  %v711_v63 = vsel %vm709_vm8, %v694_v8, -inf }
 0x1ce   : > { %v722_v45 = vsel %vm709_vm8, %v701_v20, -inf  ;;  %v717_v41 = vmax.f32 %v711_v63, %v716_v17  ;;  %v708_v20 = vsel %vm1996_vm15, %v691_v43, -1e+30  ;;  %v727_v17 = vmax.f32 %v719_v46, %v726_v40 }
 0x1cf   : > { %v723_v7 = vmax.f32 %v715_v35, %v722_v45  ;;  %v730_v35 = vsel %vm709_vm8, %v705_v38, -inf  ;;  %v736_v23 = vsel %vm709_vm8, %v708_v20, -inf }
 0x1d0   : > { %v725_v44 = vmax.f32 %v717_v41, %v724_v27  ;;  %v737_v43 = vmax.f32 %v729_v48, %v736_v23 }
 0x1d1   : > { %v731_v31 = vmax.f32 %v723_v7, %v730_v35 }
 0x1d4   : > { %v681_v8 = vpop.permute.xlu1 %680  ;;  %v686_v10 = vpop.permute.xlu0 %685 }
 0x1d5   : > { %v706_v39 = vsel %vm610_vm0, %v681_v8, -1e+30  ;;  %v707_v29 = vsel %vm1998_vm5, %v686_v10, -1e+30 }
 0x1d6   : > { %v732_v37 = vsel %vm709_vm8, %v706_v39, -inf  ;;  %v734_v63 = vsel %vm709_vm8, %v707_v29, -inf }
 0x1d7   : > { %v733_v33 = vmax.f32 %v725_v44, %v732_v37  ;;  %v735_v45 = vmax.f32 %v727_v17, %v734_v63 }
 0x1d9   : > { %v738_v2 = vmax.f32 %v731_v31, %v733_v33  ;;  %v739_v34 = vmax.f32 %v735_v45, %v737_v43 }
 0x1db   : > { %v740_v41 = vmax.f32 %v738_v2, %v739_v34 }
 0x1dd   : > { %v741_v46 = vrot.slane %v740_v41, 4 }
 0x1df   : > { %v742_v40 = vmax.f32 %v740_v41, %v741_v46 }
 0x1e1   : > { %v743_v27 = vrot.slane %v742_v40, 2 }
 0x1e3   : > { %v744_v8 = vmax.f32 %v742_v40, %v743_v27 }
 0x1e5   : > { %v745_v10 = vrot.slane %v744_v8, 1 }
 0x1e7   : > { %v746_v38 = vmax.f32 %v744_v8, %v745_v10 }
 0x1e9   : > { %v1752_v20 = vmax.f32 %v1749_v25, %v746_v38 }
 0x1eb   : > { %v753_v7 = vperm.slane %v1752_v20, 0  ;;  %1005 = vst.msk [vmem:[#allocation2] sm:$0x1] %vm1995_vm10, %v1752_v20  ;;  %v749_v48 = vsub.f32 %v1749_v25, %v1752_v20  ;;  %vm2006_vm10 = vcmp.eq.s32.totalorder %v1651_v12, %v1542_v53 }
 0x1ed   : > { %v770_v39 = vsel %vm1996_vm15, %v753_v7, 0.0  ;;  %v769_v44 = vsel %vm1998_vm5, %v753_v7, 0.0  ;;  %v768_v17 = vsel %vm610_vm0, %v753_v7, 0.0  ;;  %v767_v37 = vsel %vm609_vm14, %v753_v7, 0.0 }
 0x1ee   : > { %v816_v29 = vsel %vm709_vm8, %v770_v39, 0.0  ;;  %v813_v35 = vsel %vm709_vm8, %v769_v44, 0.0  ;;  %v810_v23 = vsel %vm709_vm8, %v768_v17, 0.0  ;;  %v765_v63 = vsel %vm607_vm12, %v753_v7, 0.0 }
 0x1ef   : > { %817 = vadd.xlane.f32.xlu1 %v816_v29  ;;  %814 = vadd.xlane.f32.xlu0 %v813_v35  ;;  %v766_v31 = vsel %vm608_vm6, %v753_v7, 0.0  ;;  %v807_v33 = vsel %vm709_vm8, %v767_v37, 0.0  ;;  %v801_v43 = vsel %vm709_vm8, %v765_v63, 0.0  ;;  %v764_v2 = vsel %vm606_vm13, %v753_v7, 0.0 }
 0x1f0   : > { %811 = vadd.xlane.f32.xlu2 %v810_v23  ;;  %v804_v45 = vsel %vm709_vm8, %v766_v31, 0.0  ;;  %v762_v34 = vsel %vm604_vm4, %v753_v7, 0.0  ;;  %v763_v41 = vsel %vm605_vm11, %v753_v7, 0.0  ;;  %v798_v46 = vsel %vm709_vm8, %v764_v2, 0.0 }
 0x1f1   : > { %v792_v40 = vsel %vm709_vm8, %v762_v34, 0.0  ;;  %v795_v27 = vsel %vm709_vm8, %v763_v41, 0.0  ;;  %v761_v8 = vsel %vm603_vm7, %v753_v7, 0.0  ;;  %v759_v10 = vsel %vm601_vm9, %v753_v7, 0.0 }
 0x1f2   : > { %v760_v38 = vsel %vm602_vm3, %v753_v7, 0.0  ;;  %v789_v39 = vsel %vm709_vm8, %v761_v8, 0.0  ;;  %v783_v44 = vsel %vm709_vm8, %v759_v10, 0.0  ;;  %v758_v29 = vsel %vm600_vm2, %v753_v7, 0.0 }
 0x1f3   : > { %v786_v17 = vsel %vm709_vm8, %v760_v38, 0.0  ;;  %v756_v35 = vsel %vm598_vm1, %v753_v7, 0.0  ;;  %v757_v23 = vsel %vm2006_vm10, %v753_v7, 0.0  ;;  %v780_v37 = vsel %vm709_vm8, %v758_v29, 0.0 }
 0x1f4   : > { %v774_v63 = vsel %vm709_vm8, %v756_v35, 0.0  ;;  %v777_v31 = vsel %vm709_vm8, %v757_v23, 0.0  ;;  %vm2007_vm15 = vcmp.eq.s32.totalorder %v1651_v12, %v1538_v28 }
 0x1f7   : > { %808 = vadd.xlane.f32.xlu1 %v807_v33  ;;  %802 = vadd.xlane.f32.xlu0 %v801_v43  ;;  %v755_v33 = vsel %vm2007_vm15, %v753_v7, 0.0  ;;  %vm2016_vm15 = vcmp.eq.s32.totalorder %v1651_v12, %v1542_v53 }
 0x1f8   : > { %805 = vadd.xlane.f32.xlu2 %v804_v45  ;;  %v771_v43 = vsel %vm709_vm8, %v755_v33, 0.0 }
 0x1ff   : > { %799 = vadd.xlane.f32.xlu1 %v798_v46  ;;  %793 = vadd.xlane.f32.xlu0 %v792_v40 }
 0x200   : > { %796 = vadd.xlane.f32.xlu2 %v795_v27 }
 0x207   : > { %790 = vadd.xlane.f32.xlu1 %v789_v39  ;;  %784 = vadd.xlane.f32.xlu0 %v783_v44 }
 0x208   : > { %787 = vadd.xlane.f32.xlu2 %v786_v17 }
 0x20f   : > { %781 = vadd.xlane.f32.xlu1 %v780_v37  ;;  %775 = vadd.xlane.f32.xlu0 %v774_v63 }
 0x210   : > { %778 = vadd.xlane.f32.xlu2 %v777_v31 }
 0x217   : > { %772 = vadd.xlane.f32.xlu1 %v771_v43 }
 0x262   : > { %v818_v45 = vpop.xlane.xlu1 %817  ;;  %v815_v2 = vpop.xlane.xlu0 %814 }
 0x263   : > { %v834_v34 = vsub.f32 %v1647_v21, %v818_v45  ;;  %v833_v41 = vsub.f32 %v1638_v13, %v815_v2  ;;  %v812_v46 = vpop.xlane.xlu2 %811 }
 0x264   : > { %v832_v40 = vsub.f32 %v1636_v26, %v812_v46 }
 0x265   : > { %v865_v27 = vmul.f32 1.442695, %v834_v34  ;;  %v863_v8 = vmul.f32 1.442695, %v833_v41 }
 0x266   : > { %v861_v10 = vmul.f32 1.442695, %v832_v40 }
 0x267   : > { %1203 = vpow2.f32 %v865_v27 }
 0x268   : > { %1205 = vpow2.f32 %v863_v8 }
 0x269   : > { %1207 = vpow2.f32 %v861_v10 }
 0x26a   : > { %v809_v38 = vpop.xlane.xlu1 %808  ;;  %v803_v7 = vpop.xlane.xlu0 %802 }
 0x26b   : > { %v831_v39 = vsub.f32 %v1642_v18, %v809_v38  ;;  %v806_v44 = vpop.xlane.xlu2 %805  ;;  %v829_v17 = vsub.f32 %v1604_v1, %v803_v7 }
 0x26c   : > { %v830_v21 = vsub.f32 %v1614_v5, %v806_v44 }
 0x26d   : > { %v1204_v29 = vpop.eup %1203  ;;  %v859_v13 = vmul.f32 1.442695, %v831_v39  ;;  %v855_v35 = vmul.f32 1.442695, %v829_v17 }
 0x26e   : > { %v1206_v23 = vpop.eup %1205  ;;  %v857_v26 = vmul.f32 1.442695, %v830_v21  ;;  %944 = vperm.xlu2 %1198, %v1204_v29  }
 0x26f   : > { %v1208_v37 = vpop.eup %1207  ;;  %1209 = vpow2.f32 %v859_v13  ;;  %939 = vperm.xlu0 %1199, %v1206_v23  }
 0x270   : > { %1211 = vpow2.f32 %v857_v26  ;;  %934 = vperm.xlu1 %1197, %v1208_v37  }
 0x271   : > { %1213 = vpow2.f32 %v855_v35 }
 0x272   : > { %v800_v63 = vpop.xlane.xlu1 %799  ;;  %v794_v31 = vpop.xlane.xlu0 %793 }
 0x273   : > { %v828_v18 = vsub.f32 %v1582_v9, %v800_v63  ;;  %v797_v33 = vpop.xlane.xlu2 %796  ;;  %v826_v1 = vsub.f32 %v1626_v19, %v794_v31 }
 0x274   : > { %v827_v5 = vsub.f32 %v1624_v11, %v797_v33 }
 0x275   : > { %v1210_v43 = vpop.eup %1209  ;;  %v853_v45 = vmul.f32 1.442695, %v828_v18  ;;  %v849_v2 = vmul.f32 1.442695, %v826_v1 }
 0x276   : > { %v1212_v34 = vpop.eup %1211  ;;  %v851_v41 = vmul.f32 1.442695, %v827_v5 }
 0x277   : > { %v1214_v46 = vpop.eup %1213  ;;  %1215 = vpow2.f32 %v853_v45  ;;  %924 = vperm.xlu2 %1198, %v1212_v34   ;;  %929 = vperm.xlu0 %1199, %v1210_v43   ;;  %v750_v43 = vmul.f32 1.442695, %v749_v48 }
 0x278   : > { %1217 = vpow2.f32 %v851_v41  ;;  %919 = vperm.xlu1 %1197, %v1214_v46  }
 0x279   : > { %1219 = vpow2.f32 %v849_v2  ;;  %v2008_v2 = vlaneseq }
 0x27a   : > { %v791_v40 = vpop.xlane.xlu1 %790  ;;  %v785_v27 = vpop.xlane.xlu0 %784 }
 0x27b   : > { %v825_v9 = vsub.f32 %v1606_v32, %v791_v40  ;;  %v788_v8 = vpop.xlane.xlu2 %787  ;;  %v823_v19 = vsub.f32 %v1579_v14, %v785_v27  ;;  %v1845_v34 = vshrl.u32 %v2008_v2, 7 }
 0x27c   : > { %v824_v11 = vsub.f32 %v1589_v15, %v788_v8 }
 0x27d   : > { %v1216_v10 = vpop.eup %1215  ;;  %v847_v38 = vmul.f32 1.442695, %v825_v9  ;;  %v843_v7 = vmul.f32 1.442695, %v823_v19  ;;  %vm1997_vm10 = vcmp.eq.s32.totalorder %v1845_v34, %v1651_v12 }
 0x27e   : > { %v1218_v39 = vpop.eup %1217  ;;  %v845_v44 = vmul.f32 1.442695, %v824_v11 }
 0x27f   : > { %v1220_v17 = vpop.eup %1219  ;;  %1221 = vpow2.f32 %v847_v38  ;;  %909 = vperm.xlu2 %1198, %v1218_v39   ;;  %914 = vperm.xlu0 %1199, %v1216_v10   ;;  %v2009_v39 = vld [vmem:[#allocation6_spill] sm:$0xff] }
 0x280   : > { %1223 = vpow2.f32 %v845_v44  ;;  %904 = vperm.xlu1 %1197, %v1220_v17   ;;  %v2010_v17 = vld [vmem:[#allocation12_spill] sm:$0xff] }
 0x281   : > { %1225 = vpow2.f32 %v843_v7 }
 0x282   : > { %v782_v21 = vpop.xlane.xlu1 %781  ;;  %v776_v29 = vpop.xlane.xlu0 %775 }
 0x283   : > { %v822_v32 = vsub.f32 %v1617_v6, %v782_v21  ;;  %v779_v13 = vpop.xlane.xlu2 %778  ;;  %v820_v14 = vsub.f32 %v1592_v16, %v776_v29 }
 0x284   : > { %v821_v15 = vsub.f32 %v1601_v22, %v779_v13 }
 0x285   : > { %v1222_v35 = vpop.eup %1221  ;;  %v841_v23 = vmul.f32 1.442695, %v822_v32  ;;  %v837_v26 = vmul.f32 1.442695, %v820_v14  ;;  %v2012_v14 = vld [vmem:[#allocation9_spill] sm:$0xff] }
 0x286   : > { %v1224_v37 = vpop.eup %1223  ;;  %v839_v63 = vmul.f32 1.442695, %v821_v15 }
 0x287   : > { %v1226_v31 = vpop.eup %1225  ;;  %1227 = vpow2.f32 %v841_v23  ;;  %894 = vperm.xlu2 %1198, %v1224_v37   ;;  %899 = vperm.xlu0 %1199, %v1222_v35   ;;  %v1237_v23 = vld [vmem:[%s1319_s12 + $0x20] sm:$0xff] }
 0x288   : > { %1229 = vpow2.f32 %v839_v63  ;;  %889 = vperm.xlu1 %1197, %v1226_v31   ;;  %v2014_v31 = vld [vmem:[#allocation10_spill] sm:$0xff] }
 0x289   : > { %1231 = vpow2.f32 %v837_v26 }
 0x28a   : > { %v773_v18 = vpop.xlane.xlu1 %772 }
 0x28b   : > { %v819_v6 = vsub.f32 %v1570_v3, %v773_v18 }
 0x28d   : > { %v1228_v33 = vpop.eup %1227  ;;  %v835_v1 = vmul.f32 1.442695, %v819_v6 }
 0x28e   : > { %v1230_v16 = vpop.eup %1229 }
 0x28f   : > { %v1232_v5 = vpop.eup %1231  ;;  %1233 = vpow2.f32 %v835_v1  ;;  %879 = vperm.xlu2 %1198, %v1230_v16   ;;  %884 = vperm.xlu0 %1199, %v1228_v33   ;;  %v2015_v33 = vld [vmem:[#allocation8_spill] sm:$0xff]  ;;  %v1238_v16 = vld [vmem:[%s1319_s12 + $0x8] sm:$0xff] }
 0x290   : > { %874 = vperm.xlu1 %1197, %v1232_v5   ;;  %1235 = vpow2.f32 %v750_v43 }
 0x295   : > { %v1234_v22 = vpop.eup %1233 }
 0x296   : > { %v1842_v45 = vpop.eup %1235 }
 0x297   : > { %869 = vperm.xlu0 %1199, %v1234_v22   ;;  %v1050_v3 = vperm.slane %v1842_v45, 0  ;;  %v1202_v22 = vld [vmem:[%s302_s8] ss:$0 sm:$0xff] }
 0x298   : > { %vm1009_vm5 = vcmp.eq.s32.totalorder %v1845_v34, %v1202_v22 }
 0x299   : > { %v1052_v41 = vsel %vm1997_vm10, %v1050_v3, 0.0  ;;  %vm2017_vm10 = vcmp.eq.s32.totalorder %v1651_v12, %v1538_v28 }
 0x29a   : > { %v1053_v46 = vsel %vm709_vm8, %v1052_v41, 0.0 }
 0x2b8   : > { %1054 = vadd.xlane.f32.xlu2 %v1053_v46  ;;  %v1239_v46 = vld [vmem:[%s1319_s12] sm:$0xff] }
 0x2c8   : > { %v1854_v25 = vpop.permute.xlu2 %944 }
 0x2c9   : > { %v1027_v20 = vmul.f32 %v1854_v25, %v1491_v50 }
 0x2cb   : > { %1028 = vmatpush.msra.mxu1 %v1027_v20 }
 0x2d1   : > { %v1864_v9 = vpop.permute.xlu2 %924 }
 0x2d2   : > { %v1023_v10 = vmul.f32 %v1864_v9, %v1433_v36  ;;  %v958_v59 = vsel %vm608_vm6, %v1864_v9, 0.0 }
 0x2d3   : > { %v984_v57 = vsel %vm709_vm8, %v958_v59, 0.0 }
 0x2d9   : > { %v910_v38 = vpop.permute.xlu2 %909 }
 0x2da   : > { %v1020_v21 = vmul.f32 %v910_v38, %v2010_v17  ;;  %v955_v56 = vsel %vm605_vm11, %v910_v38, 0.0 }
 0x2e1   : > { %v1858_v48 = vpop.permute.xlu0 %939  ;;  %v895_v32 = vpop.permute.xlu2 %894 }
 0x2e2   : > { %v1860_v40 = vpop.permute.xlu1 %934  ;;  %v1026_v27 = vmul.f32 %v1858_v48, %v1487_v49 }
 0x2e3   : > { %v1025_v8 = vmul.f32 %v1860_v40, %v1478_v47 }
 0x2e4   : > { %1029 = vmatpush.msra.mxu1 %v1026_v27 }
 0x2e6   : > { %1030 = vmatpush.msra.mxu1 %v1025_v8 }
 0x2e9   : > { %v1868_v19 = vpop.permute.xlu0 %929  ;;  %v880_v37 = vpop.permute.xlu2 %879 }
 0x2ea   : > { %v1870_v11 = vpop.permute.xlu1 %919  ;;  %v1024_v50 = vmul.f32 %v1868_v19, %v1457_v42  ;;  %v2011_v42 = vld [vmem:[#allocation11_spill] sm:$0xff]  ;;  %v1014_v1 = vmul.f32 %v880_v37, %v2015_v33  ;;  %v949_v2 = vsel %vm2016_vm15, %v880_v37, 0.0 }
 0x2eb   : > { %v1022_v49 = vmul.f32 %v1870_v11, %v1410_v30  ;;  %v2013_v30 = vld [vmem:[#allocation7_spill] sm:$0xff]  ;;  %v966_v53 = vsel %vm709_vm8, %v949_v2, 0.0  ;;  %v957_v51 = vsel %vm607_vm12, %v1870_v11, 0.0  ;;  %v960_v11 = vsel %vm610_vm0, %v1860_v40, 0.0 }
 0x2ec   : > { %1031 = vmatpush.msra.mxu1 %v1024_v50  ;;  %v1017_v35 = vmul.f32 %v895_v32, %v2013_v30  ;;  %v978_v30 = vsel %vm709_vm8, %v955_v56, 0.0  ;;  %v982_v62 = vsel %vm709_vm8, %v957_v51, 0.0  ;;  %v988_v54 = vsel %vm709_vm8, %v960_v11, 0.0 }
 0x2ee   : > { %1032 = vmatpush.msra.mxu1 %v1023_v10  ;;  %v1253_v10 = vmov 1.0  }
 0x2f0   : > { %1033 = vmatpush.msra.mxu1 %v1022_v49 }
 0x2f1   : > { %v915_v47 = vpop.permute.xlu0 %914 }
 0x2f2   : > { %v905_v7 = vpop.permute.xlu1 %904  ;;  %v1021_v44 = vmul.f32 %v915_v47, %v2009_v39  ;;  %v956_v58 = vsel %vm606_vm13, %v915_v47, 0.0  ;;  %v959_v47 = vsel %vm609_vm14, %v1868_v19, 0.0 }
 0x2f3   : > { %v1019_v29 = vmul.f32 %v905_v7, %v2011_v42  ;;  %v954_v55 = vsel %vm604_vm4, %v905_v7, 0.0  ;;  %v986_v60 = vsel %vm709_vm8, %v959_v47, 0.0 }
 0x2f4   : > { %1034 = vmatpush.msra.mxu1 %v1021_v44  ;;  %v952_v44 = vsel %vm602_vm3, %v895_v32, 0.0  ;;  %vm2020_vm3 = vcmask 57344  }
 0x2f6   : > { %1035 = vmatpush.msra.mxu1 %v1020_v21 }
 0x2f8   : > { %1036 = vmatpush.msra.mxu1 %v1019_v29  ;;  %v972_v29 = vsel %vm709_vm8, %v952_v44, 0.0 }
 0x2f9   : > { %v900_v36 = vpop.permute.xlu0 %899 }
 0x2fa   : > { %v890_v13 = vpop.permute.xlu1 %889  ;;  %v1018_v15 = vmul.f32 %v900_v36, %v2012_v14  ;;  %v953_v21 = vsel %vm603_vm7, %v900_v36, 0.0 }
 0x2fb   : > { %v1016_v26 = vmul.f32 %v1237_v23, %v890_v13  ;;  %v951_v28 = vsel %vm601_vm9, %v890_v13, 0.0  ;;  %v974_v14 = vsel %vm709_vm8, %v953_v21, 0.0 }
 0x2fc   : > { %1037 = vmatpush.msra.mxu1 %v1018_v15  ;;  %v970_v52 = vsel %vm709_vm8, %v951_v28, 0.0  ;;  %v976_v15 = vsel %vm709_vm8, %v954_v55, 0.0 }
 0x2fe   : > { %1038 = vmatpush.msra.mxu1 %v1017_v35  ;;  %v980_v35 = vsel %vm709_vm8, %v956_v58, 0.0 }
 0x300   : > { %1039 = vmatpush.msra.mxu1 %v1016_v26 }
 0x301   : > { %v885_v63 = vpop.permute.xlu0 %884 }
 0x302   : > { %v1015_v18 = vmul.f32 %v885_v63, %v2014_v31  ;;  %v875_v6 = vpop.permute.xlu1 %874  ;;  %v950_v24 = vsel %vm600_vm2, %v885_v63, 0.0  ;;  %vm2019_vm2 = vcmp.eq.s32.totalorder %v1651_v12, %v1560_v61  ;;  %v1056_v61 = vld [vmem:[#allocation4] sm:$0xff] }
 0x303   : > { %v1013_v5 = vmul.f32 %v1238_v16, %v875_v6  ;;  %v948_v43 = vsel %vm598_vm1, %v875_v6, 0.0  ;;  %v968_v39 = vsel %vm709_vm8, %v950_v24, 0.0  ;;  %vm2018_vm1 = vcmp.eq.s32.totalorder %v1651_v12, %v1573_v4 }
 0x304   : > { %1040 = vmatpush.msra.mxu1 %v1015_v18  ;;  %v964_v27 = vsel %vm709_vm8, %v948_v43, 0.0  ;;  %v961_v9 = vsel %vm2018_vm1, %v1858_v48, 0.0  ;;  %v962_v19 = vsel %vm2019_vm2, %v1854_v25, 0.0  ;;  %v1000_v48 = vld [vmem:[#allocation3] sm:$0x1] }
 0x305   : > { %v990_v0 = vsel %vm709_vm8, %v961_v9, 0.0  ;;  %v992_v31 = vsel %vm709_vm8, %v962_v19, 0.0 }
 0x306   : > { %1041 = vmatpush.msra.mxu1 %v1014_v1 }
 0x308   : > { %1042 = vmatpush.msra.mxu1 %v1013_v5  ;;  %v1001_v5 = vmul.f32 %v1842_v45, %v1000_v48 }
 0x309   : > { %v870_v3 = vpop.permute.xlu0 %869 }
 0x30a   : > { %v947_v41 = vsel %vm2017_vm10, %v870_v3, 0.0  ;;  %v1012_v20 = vmul.f32 %v1239_v46, %v870_v3 }
 0x30b   : > { %v963_v8 = vsel %vm709_vm8, %v947_v41, 0.0 }
 0x30c   : > { %v965_v50 = vadd.f32 %v964_v27, %v963_v8  ;;  %1043 = vmatpush.msra.mxu1 %v1012_v20 }
 0x30d   : > { %1149 = vmatmul.msk.f32.vlgmr.msra.gmra.mxu1 %vm1009_vm5, %v1253_v10 }
 0x30e   : > { %v967_v49 = vadd.f32 %v966_v53, %v965_v50 }
 0x310   : > { %v969_v17 = vadd.f32 %v968_v39, %v967_v49 }
 0x312   : > { %v971_v42 = vadd.f32 %v970_v52, %v969_v17 }
 0x314   : > { %v973_v13 = vadd.f32 %v972_v29, %v971_v42 }
 0x316   : > { %v975_v32 = vadd.f32 %v974_v14, %v973_v13 }
 0x318   : > { %v977_v36 = vadd.f32 %v976_v15, %v975_v32 }
 0x31a   : > { %v979_v7 = vadd.f32 %v978_v30, %v977_v36 }
 0x31c   : > { %v981_v38 = vadd.f32 %v980_v35, %v979_v7 }
 0x31e   : > { %v983_v23 = vadd.f32 %v982_v62, %v981_v38 }
 0x320   : > { %v985_v26 = vadd.f32 %v984_v57, %v983_v23 }
 0x322   : > { %v987_v37 = vadd.f32 %v986_v60, %v985_v26 }
 0x324   : > { %v989_v63 = vadd.f32 %v988_v54, %v987_v37 }
 0x326   : > { %v991_v40 = vadd.f32 %v990_v0, %v989_v63 }
 0x328   : > { %v993_v18 = vadd.f32 %v992_v31, %v991_v40 }
 0x32a   : > { %v994_v6 = vrot.slane %v993_v18, 4 }
 0x32b   : > { %v1055_v25 = vpop.xlane.xlu2 %1054 }
 0x32c   : > { %v995_v33 = vadd.f32 %v994_v6, %v993_v18  ;;  %v1057_v2 = vmul.f32 %v1056_v61, %v1055_v25 }
 0x32e   : > { %v996_v1 = vrot.slane %v995_v33, 2 }
 0x330   : > { %v997_v4 = vadd.f32 %v996_v1, %v995_v33 }
 0x332   : > { %v998_v16 = vrot.slane %v997_v4, 1 }
 0x334   : > { %v999_v22 = vadd.f32 %v998_v16, %v997_v4 }
 0x336   : > { %v1002_v43 = vadd.f32 %v1001_v5, %v999_v22 }
 0x338   : > { %1004 = vst.msk [vmem:[#allocation3] sm:$0x1] %vm2020_vm3, %v1002_v43 }
 0x389   : > { %1063 = sbr.rel (%p1150_p6) target bundleno = 1053 (0x41d), region = 56 }
 0x38a   : > { %v1045_v3 = vpop.f32.mrf.mxu1 }
 0x38b   : > { %v1058_v41 = vadd.f32 %v1057_v2, %v1045_v3 }
 0x38d   : > { %1059 = vst [vmem:[#allocation4] sm:$0xff] %v1058_v41 }
 0x38e   : > { %v1064_v46 = vld [vmem:[#allocation3] sm:$0x1]  ;;  %vm2021_vm9 = vcmp.eq.s32.totalorder %v1845_v34, %v1651_v12 }
 0x38f   : > { %v1065_v20 = vadd.f32 1e-16, %v1064_v46 }
 0x391   : > { %1240 = vrcp.f32 %v1065_v20  ;;  %v1077_v24 = vand.u32 2147483648, %v1065_v20  ;;  %vm1071_vm4 = vweird.f32 %v1065_v20  ;;  %v1075_v50 = vand.u32 2147483647, %v1065_v20 }
 0x393   : > { %v1078_v10 = vor.u32 1.1754944e-38, %v1077_v24  ;;  %vm1076_vm7 = vcmp.eq.f32.partialorder %v1075_v50, 8.507059e+37 }
 0x394   : > { %v1087_v21 = vld [vmem:[#allocation4] sm:$0xff] }
 0x397   : > { %v1241_v27 = vpop.eup %1240 }
 0x398   : > { %v1067_v8 = vmul.f32 %v1241_v27, %v1065_v20  ;;  %vm1072_vm5 = vweird.f32 %v1241_v27 }
 0x399   : > { %vm1073_vm6 = vmor %vm1071_vm4, %vm1072_vm5 }
 0x39a   : > { %v1068_v45 = vsub.f32 1.0, %v1067_v8 }
 0x39c   : > { %v1069_v53 = vmul.f32 %v1241_v27, %v1068_v45 }
 0x39e   : > { %v1070_v28 = vadd.f32 %v1241_v27, %v1069_v53 }
 0x3a0   : > { %v1074_v49 = vsel %vm1073_vm6, %v1241_v27, %v1070_v28 }
 0x3a1   : > { %v1079_v39 = vsel %vm1076_vm7, %v1078_v10, %v1074_v49 }
 0x3a2   : > { %v1081_v44 = vperm.slane %v1079_v39, 0 }
 0x3a4   : > { %v1083_v17 = vsel %vm2021_vm9, %v1081_v44, 0.0 }
 0x3a5   : > { %v1084_v52 = vsel %vm709_vm8, %v1083_v17, 0.0 }
 0x3a6   : > { %1085 = vadd.xlane.f32.xlu0 %v1084_v52 }
 0x419   : > { %v1086_v42 = vpop.xlane.xlu0 %1085 }
 0x41a   : > { %v1088_v29 = vmul.f32 %v1087_v21, %v1086_v42 }
 0x41c   : > { %1089 = vst [vmem:[%s1984_s7] sm:$0xff] %v1088_v29 }
 0x41d PF: > { %s18_s26 = sadd.s32 1, %s1248_s26  }
 0x41e   : > { %p15_p7 = scmp.ge.s32.totalorder %s18_s26, 5  }
 0x420   :  { %17 = sbr.rel (!%p15_p7) target bundleno = 2 (0x2), region = 88 }

</bundles_post_ra>
